<compile_context>
chip_gen: v7x
topology: tpu7x:2x2x1
jax: 0.10.0
libtpu: 0.0.40
codegen_flags: <defaults>
</compile_context>

<pallas_src>
import functools

import jax
import jax.numpy as jnp
from jax import lax
from jax.experimental import pallas as pl
from jax.experimental.pallas import tpu as pltpu  # noqa: F401  (TPU backend)

TEMPERATURE = 8.0
PROJ_DIM = 64  # nn.Linear(latent_dim, 64)


def _attention_kernel(q_ref, k_ref, wq_ref, bq_ref, wk_ref, bk_ref, out_ref):
    """q_ref: [B, D] query, k_ref: [N, D] keys.
    wq_ref: [D, 64] Wq^T with 1/temperature folded in, bq_ref: [1, 64] (scaled).
    wk_ref: [D, 64] Wk^T, bk_ref: [1, 64].
    out_ref: [B, N] softmax attention weights (softmax over axis=1)."""
    # Two small MXU projections; both results are lane-0 aligned 64-wide tiles.
    q = jnp.dot(q_ref[...], wq_ref[...],
                preferred_element_type=jnp.float32) + bq_ref[...]          # [B, 64]
    k = jnp.dot(k_ref[...], wk_ref[...],
                preferred_element_type=jnp.float32) + bk_ref[...]          # [N, 64]

    # scores = q @ k^T as a transposed-RHS contraction (no explicit XLU .T).
    # Temperature was folded into Wq/bq at init time, so no per-call divide.
    scores = lax.dot_general(q, k, (((1,), (1,)), ((), ())),
                             preferred_element_type=jnp.float32)           # [B, N]

    # Numerically-stable softmax over axis=1 (num_examples), all in f32.
    m = jnp.max(scores, axis=1, keepdims=True)
    e = jnp.exp(scores - m)
    denom = jnp.sum(e, axis=1, keepdims=True)
    # EUP reciprocal + VPU multiply instead of a divide (exact to hold 1e-5).
    out_ref[...] = (e * pl.reciprocal(denom, approx=False)).astype(out_ref.dtype)


def prepare_attention_params(wq, bq, wk, bk):
    """One-time (init-time) parameter prep, outside the per-call hot path.

    wq, wk: [64, D] torch nn.Linear layout; bq, bk: [64].
    Returns wq_t [D, 64], bq_row [1, 64] (1/temperature folded into both),
    wk_t [D, 64], bk_row [1, 64].
    """
    inv_t = jnp.float32(1.0 / TEMPERATURE)
    wq_t = wq.T.astype(jnp.float32) * inv_t        # [D, 64]
    bq_row = (bq.astype(jnp.float32) * inv_t).reshape(1, PROJ_DIM)
    wk_t = wk.T.astype(jnp.float32)                # [D, 64]
    bk_row = bk.astype(jnp.float32).reshape(1, PROJ_DIM)
    return wq_t, bq_row, wk_t, bk_row


@functools.partial(jax.jit, static_argnames=())
def attention_mechanism(query, keys, wq_t, bq_row, wk_t, bk_row):
    """query: [B, D], keys: [N, D], params from prepare_attention_params.
    Returns attention weights [B, N]."""
    B, D = query.shape
    N, _ = keys.shape

    full = lambda shape: pl.BlockSpec(shape, lambda: (0,) * len(shape))

    return pl.pallas_call(
        _attention_kernel,
        out_shape=jax.ShapeDtypeStruct((B, N), jnp.float32),
        in_specs=[
            full((B, D)),
            full((N, D)),
            full(wq_t.shape),
            full(bq_row.shape),
            full(wk_t.shape),
            full(bk_row.shape),
        ],
        out_specs=full((B, N)),
    )(query.astype(jnp.float32), keys.astype(jnp.float32),
      wq_t, bq_row, wk_t, bk_row)


def reference(query, keys, wq, bq, wk, bk):
    q = query @ wq.T + bq
    k = keys @ wk.T + bk
    scores = (q @ k.T) / TEMPERATURE
    return jax.nn.softmax(scores, axis=1)


if __name__ == "__main__":
    key = jax.random.PRNGKey(0)
    k1, k2, k3, k4, k5, k6 = jax.random.split(key, 6)

    latent_dim = 32
    batch_size = 8
    num_examples = 16

    query = jax.random.normal(k1, (batch_size, latent_dim), dtype=jnp.float32)
    keys = jax.random.normal(k2, (num_examples, latent_dim), dtype=jnp.float32)

    # Deterministic parameter init (shapes match nn.Linear(latent_dim, 64)).
    bound = 1.0 / (latent_dim ** 0.5)
    wq = jax.random.uniform(k3, (PROJ_DIM, latent_dim), jnp.float32, -bound, bound)
    bq = jax.random.uniform(k4, (PROJ_DIM,), jnp.float32, -bound, bound)
    wk = jax.random.uniform(k5, (PROJ_DIM, latent_dim), jnp.float32, -bound, bound)
    bk = jax.random.uniform(k6, (PROJ_DIM,), jnp.float32, -bound, bound)

    # One-time parameter prep (init-time, outside the per-call hot path).
    params = prepare_attention_params(wq, bq, wk, bk)
    params = jax.block_until_ready(params)

    attn = attention_mechanism(query, keys, *params)
    jax.block_until_ready(attn)

    ref = reference(query, keys, wq, bq, wk, bk)
    assert attn.shape == (batch_size, num_examples)
    assert jnp.allclose(attn, ref, atol=1e-5, rtol=1e-5), "mismatch vs reference"
    # rows sum to 1
    assert jnp.allclose(jnp.sum(attn, axis=1), jnp.ones(batch_size), atol=1e-5)

    print("KERNEL_OK")
</pallas_src>

<mosaic_0001>
module attributes {stable_mosaic.version = 11 : i64} {
  func.func @_attention_kernel(%arg0: memref<8x32xf32, #tpu.memory_space<vmem>>, %arg1: memref<16x32xf32, #tpu.memory_space<vmem>>, %arg2: memref<32x64xf32, #tpu.memory_space<vmem>>, %arg3: memref<1x64xf32, #tpu.memory_space<vmem>>, %arg4: memref<32x64xf32, #tpu.memory_space<vmem>>, %arg5: memref<1x64xf32, #tpu.memory_space<vmem>>, %arg6: memref<8x16xf32, #tpu.memory_space<vmem>>) attributes {dimension_semantics = [], scalar_prefetch = 0 : i64, scratch_operands = 0 : i64, tpu.core_type = #tpu.core_type<tc>} {
    %c0 = arith.constant 0 : index
    %c0_0 = arith.constant 0 : index
    %0 = vector.load %arg0[%c0, %c0_0] : memref<8x32xf32, #tpu.memory_space<vmem>>, vector<8x32xf32>
    %c0_1 = arith.constant 0 : index
    %c0_2 = arith.constant 0 : index
    %1 = vector.load %arg2[%c0_1, %c0_2] : memref<32x64xf32, #tpu.memory_space<vmem>>, vector<32x64xf32>
    %cst = arith.constant dense<0.000000e+00> : vector<8x64xf32>
    %2 = tpu.matmul %0, %1, %cst {dimension_numbers = #tpu.dot_dimension_numbers<[1], [0], [0], [1], [0, 0, 1, 1], [], []>} : vector<8x32xf32>, vector<32x64xf32>, vector<8x64xf32> -> vector<8x64xf32>
    %c0_3 = arith.constant 0 : index
    %c0_4 = arith.constant 0 : index
    %3 = vector.load %arg3[%c0_3, %c0_4] : memref<1x64xf32, #tpu.memory_space<vmem>>, vector<1x64xf32>
    %4 = vector.broadcast %3 : vector<1x64xf32> to vector<8x64xf32>
    %5 = arith.addf %2, %4 : vector<8x64xf32>
    %c0_5 = arith.constant 0 : index
    %c0_6 = arith.constant 0 : index
    %6 = vector.load %arg1[%c0_5, %c0_6] : memref<16x32xf32, #tpu.memory_space<vmem>>, vector<16x32xf32>
    %c0_7 = arith.constant 0 : index
    %c0_8 = arith.constant 0 : index
    %7 = vector.load %arg4[%c0_7, %c0_8] : memref<32x64xf32, #tpu.memory_space<vmem>>, vector<32x64xf32>
    %cst_9 = arith.constant dense<0.000000e+00> : vector<16x64xf32>
    %8 = tpu.matmul %6, %7, %cst_9 {dimension_numbers = #tpu.dot_dimension_numbers<[1], [0], [0], [1], [0, 0, 1, 1], [], []>} : vector<16x32xf32>, vector<32x64xf32>, vector<16x64xf32> -> vector<16x64xf32>
    %c0_10 = arith.constant 0 : index
    %c0_11 = arith.constant 0 : index
    %9 = vector.load %arg5[%c0_10, %c0_11] : memref<1x64xf32, #tpu.memory_space<vmem>>, vector<1x64xf32>
    %10 = vector.broadcast %9 : vector<1x64xf32> to vector<16x64xf32>
    %11 = arith.addf %8, %10 : vector<16x64xf32>
    %cst_12 = arith.constant dense<0.000000e+00> : vector<8x16xf32>
    %12 = tpu.matmul %5, %11, %cst_12 {dimension_numbers = #tpu.dot_dimension_numbers<[1], [1], [0], [0], [0, 0, 1, 0], [], []>} : vector<8x64xf32>, vector<16x64xf32>, vector<8x16xf32> -> vector<8x16xf32>
    %cst_13 = arith.constant dense<0xFF800000> : vector<8xf32>
    %13 = vector.multi_reduction <maximumf>, %12, %cst_13 [1] : vector<8x16xf32> to vector<8xf32>
    %14 = vector.shape_cast %13 : vector<8xf32> to vector<8x1xf32>
    %15 = vector.broadcast %14 : vector<8x1xf32> to vector<8x16xf32>
    %16 = arith.subf %12, %15 : vector<8x16xf32>
    %17 = math.exp %16 : vector<8x16xf32>
    %cst_14 = arith.constant dense<0.000000e+00> : vector<8xf32>
    %18 = vector.multi_reduction <add>, %17, %cst_14 [1] : vector<8x16xf32> to vector<8xf32>
    %19 = vector.shape_cast %18 : vector<8xf32> to vector<8x1xf32>
    %20 = tpu.reciprocal %19 : vector<8x1xf32> -> vector<8x1xf32>
    %21 = vector.broadcast %20 : vector<8x1xf32> to vector<8x16xf32>
    %22 = arith.mulf %17, %21 : vector<8x16xf32>
    %c0_15 = arith.constant 0 : index
    %c0_16 = arith.constant 0 : index
    %23 = vector.load %arg6[%c0_15, %c0_16] : memref<8x16xf32, #tpu.memory_space<vmem>>, vector<8x16xf32>
    tpu.vector_store %arg6[%c0_15, %c0_16], %22 {strides = array<i32>} : memref<8x16xf32, #tpu.memory_space<vmem>>, vector<8x16xf32>,
    return
  }
}

</mosaic_0001>

<bundles_post_ra>
// kernel: attention_mechanism.1
= control target key start
LH: loop header
LB: loop body
LE: loop exit
PB: predicated region body
PF: predicated region fallthrough
CT: control target
= control target key end

     0   :  { %11 = vsyncpa [#allocation3], 0  ;;  %s696_s0 = inlined_call_operand.hbm [shape: f32[8,32], index: 0, kind: input, shape index: {}]   ;;  %s697_s1 = inlined_call_operand.hbm [shape: f32[16,32], index: 1, kind: input, shape index: {}]   ;;  %s698_s2 = inlined_call_operand.hbm [shape: f32[32,64], index: 2, kind: input, shape index: {}]   ;;  %s699_s3 = inlined_call_operand.vmem [shape: f32[1,64], index: 3, kind: input, shape index: {}]   ;;  %s700_s4 = inlined_call_operand.hbm [shape: f32[32,64], index: 4, kind: input, shape index: {}]   ;;  %s701_s5 = inlined_call_operand.vmem [shape: f32[1,64], index: 5, kind: input, shape index: {}]   ;;  %s702_s6 = inlined_call_operand.hbm [shape: f32[8,16], index: 6, kind: output, shape index: {}]  }
   0x1   :  { %12 = vsyncpa [#allocation6], 0 }
   0x2   :  { %13 = vsyncpa [#allocation9], 0 }
   0x3   :  { %14 = vsyncpa [#allocation4], 0  ;;  %s568_s21 = smov [#allocation5]   ;;  %s450_s25 = scalar_lea.hbm %s697_s1, 256 }
   0x4   :  { %s30_s22 = sshll.u32 %s568_s21, 4  ;;  %p451_p0 = scmp.ne.s32.totalorder %s697_s1, %s450_s25  ;;  %s31_s22 = int_to_ptr.vmem [resolvable:$true] %s30_s22 }
   0x5   :  { %p454_p1 = scmp.lt.u32.totalorder %s450_s25, %s697_s1 }
   0x7   :  { %p456_p2 = pnand %p454_p1, %p451_p0 }
   0x9   :  { %459 = shalt.err (!%p456_p2)
}
   0xa   :  { %s460_s30 = scalar_lea.vmem %s31_s22, 256  ;;  %p465_p4 = scmp.lt.s32.totalorder %s31_s22, %s31_s22 }
   0xb   :  { %p461_p3 = scmp.ne.s32.totalorder %s31_s22, %s460_s30  ;;  %p466_p5 = scmp.lt.s32.totalorder %s460_s30, %s460_s30 }
   0xd   :  { %p467_p6 = por %p466_p5, %p465_p4 }
   0xf   :  { %p468_p7 = pnand %p467_p6, %p461_p3 }
  0x11   :  { %471 = shalt.err (!%p468_p7)
}
  0x12   :  { %s569_s7 = smov 128   ;;  %s570_s8 = smov 8  }
  0x13   :  { %36 = dma.hbm_to_vmem [thread:$0]  %s697_s1, 256, %s31_s22, [#allocation6], %s569_s7, %s569_s7, %s570_s8  }
  0x14   :  { %s571_s11 = smov [#allocation2]   ;;  %s572_s13 = smov [#allocation7]  }
  0x15   :  { %s21_s12 = sshll.u32 %s571_s11, 4  ;;  %s42_s14 = sshll.u32 %s572_s13, 4  ;;  %s22_s12 = int_to_ptr.vmem [resolvable:$true] %s21_s12  ;;  %s43_s14 = int_to_ptr.vmem [resolvable:$true] %s42_s14 }
  0x16   :  { %s472_s17 = scalar_lea.hbm %s696_s0, 128 }
  0x17   :  { %p473_p8 = scmp.ne.s32.totalorder %s696_s0, %s472_s17  ;;  %p476_p9 = scmp.lt.u32.totalorder %s472_s17, %s696_s0 }
  0x19   :  { %p478_p10 = pnand %p476_p9, %p473_p8 }
  0x1b   :  { %481 = shalt.err (!%p478_p10)
}
  0x1c   :  { %s482_s1 = scalar_lea.vmem %s22_s12, 128  ;;  %p487_p12 = scmp.lt.s32.totalorder %s22_s12, %s22_s12 }
  0x1d   :  { %p483_p11 = scmp.ne.s32.totalorder %s22_s12, %s482_s1  ;;  %p488_p13 = scmp.lt.s32.totalorder %s482_s1, %s482_s1 }
  0x1f   :  { %p489_p0 = por %p488_p13, %p487_p12 }
  0x21   :  { %p490_p1 = pnand %p489_p0, %p483_p11 }
  0x23   :  { %493 = shalt.err (!%p490_p1)
}
  0x24   :  { %24 = dma.hbm_to_vmem [thread:$0]  %s696_s0, 128, %s22_s12, [#allocation3]  }
  0x25   :  { %s494_s26 = scalar_lea.hbm %s698_s2, 512 }
  0x26   :  { %p495_p2 = scmp.ne.s32.totalorder %s698_s2, %s494_s26  ;;  %p498_p3 = scmp.lt.u32.totalorder %s494_s26, %s698_s2 }
  0x28   :  { %p500_p4 = pnand %p498_p3, %p495_p2 }
  0x2a   :  { %503 = shalt.err (!%p500_p4)
}
  0x2b   :  { %s504_s9 = scalar_lea.vmem %s43_s14, 512  ;;  %p509_p6 = scmp.lt.s32.totalorder %s43_s14, %s43_s14 }
  0x2c   :  { %p505_p5 = scmp.ne.s32.totalorder %s43_s14, %s504_s9  ;;  %p510_p7 = scmp.lt.s32.totalorder %s504_s9, %s504_s9 }
  0x2e   :  { %p511_p8 = por %p510_p7, %p509_p6 }
  0x30   :  { %p512_p9 = pnand %p511_p8, %p505_p5 }
  0x32   :  { %515 = shalt.err (!%p512_p9)
}
  0x33   :  { %48 = dma.hbm_to_vmem [thread:$0]  %s698_s2, 512, %s43_s14, [#allocation6], %s569_s7, %s569_s7, %s570_s8  }
  0x34   :  { %s573_s11 = smov [#allocation8]   ;;  %s516_s16 = scalar_lea.hbm %s700_s4, 512 }
  0x35   :  { %s56_s12 = sshll.u32 %s573_s11, 4  ;;  %p517_p10 = scmp.ne.s32.totalorder %s700_s4, %s516_s16  ;;  %s57_s12 = int_to_ptr.vmem [resolvable:$true] %s56_s12 }
  0x36   :  { %p520_p11 = scmp.lt.u32.totalorder %s516_s16, %s700_s4 }
  0x38   :  { %p522_p12 = pnand %p520_p11, %p517_p10 }
  0x3a   :  { %525 = shalt.err (!%p522_p12)
}
  0x3b   :  { %s526_s21 = scalar_lea.vmem %s57_s12, 512  ;;  %p531_p0 = scmp.lt.s32.totalorder %s57_s12, %s57_s12 }
  0x3c   :  { %p527_p13 = scmp.ne.s32.totalorder %s57_s12, %s526_s21  ;;  %p532_p1 = scmp.lt.s32.totalorder %s526_s21, %s526_s21 }
  0x3e   :  { %p533_p2 = por %p532_p1, %p531_p0 }
  0x40   :  { %p534_p3 = pnand %p533_p2, %p527_p13 }
  0x42   :  { %537 = shalt.err (!%p534_p3)
}
  0x43   :  { %62 = dma.hbm_to_vmem [thread:$0]  %s700_s4, 512, %s57_s12, [#allocation9], %s569_s7, %s569_s7, %s570_s8  }
  0x44   :  { %560 = dma.done.wait [#allocation3], 128  }
  0x45   :  { %561 = vsyncadd [#allocation3], 4294967168 }
  0x46   :  { %562 = dma.done.wait [#allocation6], 768  }
  0x47   :  { %563 = vsyncadd [#allocation6], 4294966528 }
  0x48   :  { %564 = dma.done.wait [#allocation9], 512  }
  0x49   :  { %565 = vsyncadd [#allocation9], 4294966784  ;;  %v574_v0 = vmov 0.0|0.0   ;;  %vm575_vm0 = vmmov 0   ;;  %v576_v1 = vmov 0.0   ;;  %vm89_vm1 = vcmask 261120  }
  0x4a   :  { %418 = vmatprep.subr.bf16.mxu0 %v574_v0  ;;  %397 = vmatprep.mubr.msk.f32.mxu0 %vm575_vm0, %v576_v1  ;;  %v165_v2 = vld [vmem:[#allocation8] sm:$0xff]  ;;  %v166_v3 = vld [vmem:[#allocation8 + $0x8] sm:$0xff]  ;;  %v167_v4 = vld [vmem:[#allocation8 + $0x10] sm:$0xff]  ;;  %vm257_vm2 = vcmask 523264   ;;  %vm337_vm4 = vcmask 130048  }
  0x4b   :  { %v424_v5 = vpack.c.bf16 %v166_v3, %v165_v2  ;;  %v168_v6 = vld [vmem:[#allocation8 + $0x18] sm:$0xff]  ;;  %v163_v7 = vld [vmem:[#allocation5] sm:$0xff]  ;;  %v78_v9 = vld [vmem:[#allocation7] sm:$0xff] }
  0x4c   :  { %v428_v8 = vpack.c.bf16 %v168_v6, %v167_v4  ;;  %408 = vmatprep.mubr.msk.f32.mxu1 %vm89_vm1, %v163_v7  ;;  %v79_v10 = vld [vmem:[#allocation7 + $0x8] sm:$0xff]  ;;  %v80_v11 = vld [vmem:[#allocation7 + $0x10] sm:$0xff]  ;;  %v81_v13 = vld [vmem:[#allocation7 + $0x18] sm:$0xff] }
  0x4d   :  { %425 = vmatprep.subr.bf16.mxu1 %v424_v5  ;;  %v419_v12 = vpack.c.bf16 %v79_v10, %v78_v9  ;;  %v422_v14 = vpack.c.bf16 %v81_v13, %v80_v11  ;;  %v164_v15 = vld [vmem:[#allocation5 + $0x8] sm:$0xff]  ;;  %v77_v16 = vld [vmem:[#allocation2] sm:$0xff]  ;;  %vm434_vm3 = vmpackc.low %vm257_vm2, %vm257_vm2 }
  0x4e   :  { %427 = vmatpush3.bf16.msra.mxu1 %v424_v5  ;;  %v369_v17 = vld [vmem:[%s701_s5] ss:$0 sm:$0xff]  ;;  %s577_s5 = smov [#allocation10]  }
  0x4f   :  { %429 = vmatprep.subr.bf16.mxu1 %v428_v8  ;;  %420 = vmatpush3.bf16.msra.mxu0 %v419_v12  ;;  %v367_v25 = vld [vmem:[%s699_s3] ss:$0 sm:$0xff]  ;;  %s356_s3 = sshll.u32 %s577_s5, 4  ;;  %s357_s3 = int_to_ptr.vmem [resolvable:$true] %s356_s3 }
  0x50   :  { %421 = vmatprep.subr.bf16.mxu0 %v574_v0  ;;  %s538_s22 = scalar_lea.vmem %s357_s3, 128  ;;  %p543_p5 = scmp.lt.s32.totalorder %s357_s3, %s357_s3 }
  0x51   :  { %p539_p4 = scmp.ne.s32.totalorder %s357_s3, %s538_s22  ;;  %p544_p6 = scmp.lt.s32.totalorder %s538_s22, %s538_s22 }
  0x52   :  { %431 = vmatpush3.bf16.msra.mxu1 %v428_v8 }
  0x53   :  { %423 = vmatpush3.bf16.msra.mxu0 %v422_v14  ;;  %p545_p7 = por %p544_p6, %p543_p5 }
  0x54   :  { %432 = vmatprep.subr.bf16.mxu0 %v574_v0 }
  0x55   :  { %409 = vmatmul.mubr.msk.f32.vlgmr.msra.gmra.mrb[0].mxu1 %vm89_vm1, %v164_v15  ;;  %p546_p8 = pnand %p545_p7, %p539_p4 }
  0x56   :  { %398 = vmatmul.mubr.msk.f32.vlgmr.msra.gmra.mrb[0].mxu0 %vm89_vm1, %v77_v16 }
  0x57   :  { %415 = vmatprep.mubr.msk.f32.mxu0 %vm575_vm0, %v576_v1 }
 0x128   :  { %v410_v18 = vpop.f32.mrb[0].mxu1 }
 0x129   :  { %v254_v19 = vadd.f32 %v410_v18, %v369_v17  ;;  %v248_v20 = vpop.f32.mrb[1].mxu1  ;;  %v159_v21 = vpop.f32.mrb[0].mxu0 }
 0x12a   :  { %v249_v22 = vadd.f32 %v369_v17, %v248_v20  ;;  %v399_v23 = vpop.f32.mrb[1].mxu0  ;;  %v160_v26 = vadd.f32 %v367_v25, %v159_v21 }
 0x12c   :  { %v433_v24 = vpack.c.bf16 %v254_v19, %v249_v22 }
 0x12e   :  { %435 = vmatpush3.bf16.xpose.msk.msra.mxu0 %vm434_vm3, %v433_v24 }
 0x135   :  { %416 = vmatmul.mubr.msk.f32.vlgmr.msra.gmra.mrb[2].mxu0 %vm257_vm2, %v160_v26 }
 0x208   :  { %v333_v27 = vpop.f32.mrb[2].mxu0 }
 0x209   :  { %v417_v28 = vpop.f32.mrb[3].mxu0  ;;  %v338_v29 = vsel %vm337_vm4, %v333_v27, -inf }
 0x20a   :  { %339 = vmax.xlane.f32.xlu0 %v338_v29 }
 0x297   :  { %v340_v30 = vpop.xlane.xlu0 %339 }
 0x298   :  { %v341_v31 = vsub.f32 %v333_v27, %v340_v30 }
 0x29a   :  { %v342_v32 = vmul.f32 1.442695, %v341_v31 }
 0x29c   :  { %446 = vpow2.f32 %v342_v32 }
 0x2a6   :  { %v447_v33 = vpop.eup %446 }
 0x2a7   :  { %v344_v34 = vsel %vm337_vm4, %v447_v33, 0.0 }
 0x2a8   :  { %345 = vadd.xlane.f32.xlu0 %v344_v34 }
 0x335   :  { %v346_v35 = vpop.xlane.xlu0 %345 }
 0x336   :  { %448 = vrcp.f32 %v346_v35 }
 0x340   :  { %v449_v36 = vpop.eup %448 }
 0x341   :  { %v348_v37 = vmul.f32 %v449_v36, %v447_v33 }
 0x343   :  { %349 = vst.msk [vmem:[#allocation10] sm:$0xff] %vm337_vm4, %v348_v37 }
 0x344   :  { %549 = shalt.err (!%p546_p8)
}
 0x345   :  { %s550_s25 = scalar_lea.hbm %s702_s6, 128 }
 0x346   :  { %p551_p9 = scmp.ne.s32.totalorder %s702_s6, %s550_s25  ;;  %p554_p10 = scmp.lt.u32.totalorder %s550_s25, %s702_s6 }
 0x348   :  { %p556_p11 = pnand %p554_p10, %p551_p9 }
 0x34a   :  { %559 = shalt.err (!%p556_p11)
}
 0x34b   :  { %359 = dma.vmem_to_hbm [thread:$0]  %s357_s3, 128, %s702_s6, [#allocation4]  }
 0x34c   :  { %566 = dma.done.wait [#allocation4], 128  }
 0x34d   :  { %567 = vsyncadd [#allocation4], 4294967168 }
 0x34e   :  { %363 = vsyncpa [#allocation3], 1 }
 0x34f   :  { %364 = vsyncpa [#allocation6], 1 }
 0x350   :  { %365 = vsyncpa [#allocation9], 1 }
 0x351   :  { %366 = vsyncpa [#allocation4], 1 }

</bundles_post_ra>
